<compile_context>
chip_gen: v6e
topology: v6e:2x2x1
jax: 0.10.0
libtpu: 0.0.40
codegen_flags: <defaults>
</compile_context>

<pallas_src>
import jax
import jax.numpy as jnp
from jax.experimental import pallas as pl
from jax.experimental.pallas import tpu as pltpu


_LANE = 128


def _round_up(n, m):
    return ((n + m - 1) // m) * m


def qnet_kernel(x_ref, w1_ref, b1_ref, w2_ref, b2_ref, w3_ref, b3_ref, out_ref):
    # fc1 + ReLU (tiny K; amortized by the large M tile)
    h = jnp.dot(x_ref[...], w1_ref[...], preferred_element_type=jnp.float32)
    h = jnp.maximum(h + b1_ref[...], 0.0)
    # fc2 + ReLU (cast back to compute dtype so bf16 path keeps feeding the MXU in bf16)
    h = jnp.dot(h.astype(w2_ref.dtype), w2_ref[...],
                preferred_element_type=jnp.float32)
    h = jnp.maximum(h + b2_ref[...], 0.0)
    # fc3 -- output lanes are zero-padded to 128 => unmasked full-lane store
    o = jnp.dot(h.astype(w3_ref.dtype), w3_ref[...],
                preferred_element_type=jnp.float32)
    out_ref[...] = (o + b3_ref[...]).astype(out_ref.dtype)


def qnetwork_forward(x, params, *, compute_dtype=jnp.float32):
    """x: [B, state_size]. params: weights pre-transposed to [in, out], biases [1, out]."""
    w1, b1, w2, b2, w3, b3 = (params["w1"], params["b1"], params["w2"],
                              params["b2"], params["w3"], params["b3"])
    B, S = x.shape
    H1 = w1.shape[1]
    H2 = w2.shape[1]
    A = w3.shape[1]

    # ---- tile / padding choices -------------------------------------------
    sub = 16 if compute_dtype == jnp.bfloat16 else 8   # sublane packing granule
    b_min = _round_up(B, sub)
    if b_min <= 512:
        # Small batch: one grid step; per-step (~0.35 us) overhead would dominate.
        tile = b_min
    else:
        # Large batch: big M tiles (multiple of 128), capped at 1024 so v7x
        # still gets >= 2 parallel grid steps across its two TensorCores.
        tile = min(1024, _round_up(pl.cdiv(b_min, 2), _LANE))
    B_pad = _round_up(b_min, tile)
    A_pad = _round_up(A, _LANE)      # lane-dense output

    # ---- input prep ---------------------------------------------------------
    xp = x
    if B_pad != B:
        xp = jnp.pad(xp, ((0, B_pad - B), (0, 0)))
    xp = xp.astype(compute_dtype)
    w1c = w1.astype(compute_dtype)
    w2c = w2.astype(compute_dtype)
    w3p = jnp.pad(w3, ((0, 0), (0, A_pad - A))).astype(compute_dtype)
    b1f = b1.astype(jnp.float32)
    b2f = b2.astype(jnp.float32)
    b3p = jnp.pad(b3, ((0, 0), (0, A_pad - A))).astype(jnp.float32)

    grid = (B_pad // tile,)
    # Weights / biases are tiny (~20 KB): every grid step gets the full tensors.
    full = lambda shape: pl.BlockSpec(shape, lambda i: (0,) * len(shape))

    out = pl.pallas_call(
        qnet_kernel,
        out_shape=jax.ShapeDtypeStruct((B_pad, A_pad), jnp.float32),
        grid=grid,
        in_specs=[
            pl.BlockSpec((tile, S), lambda i: (i, 0)),   # x tile
            full((S, H1)), full((1, H1)),                # fc1
            full((H1, H2)), full((1, H2)),               # fc2
            full((H2, A_pad)), full((1, A_pad)),         # fc3 (lane-padded)
        ],
        out_specs=pl.BlockSpec((tile, A_pad), lambda i: (i, 0)),
        compiler_params=pltpu.CompilerParams(
            dimension_semantics=("parallel",),
        ),
    )(xp, w1c, b1f, w2c, b2f, w3p, b3p)

    return out[:B, :A]


def init_params(key, state_size, action_size, hidden=64):
    """PyTorch-Linear-style init (uniform +-1/sqrt(fan_in)); weights stored as [in, out]."""
    ks = jax.random.split(key, 6)

    def linear(kw, kb, fan_in, fan_out):
        bound = 1.0 / jnp.sqrt(fan_in)
        w = jax.random.uniform(kw, (fan_in, fan_out), jnp.float32, -bound, bound)
        b = jax.random.uniform(kb, (1, fan_out), jnp.float32, -bound, bound)
        return w, b

    w1, b1 = linear(ks[0], ks[1], state_size, hidden)
    w2, b2 = linear(ks[2], ks[3], hidden, hidden)
    w3, b3 = linear(ks[4], ks[5], hidden, action_size)
    return {"w1": w1, "b1": b1, "w2": w2, "b2": b2, "w3": w3, "b3": b3}


def qnetwork_ref(x, params, compute_dtype=jnp.float32):
    cd = compute_dtype
    h = jnp.maximum(
        jnp.dot(x.astype(cd), params["w1"].astype(cd),
                preferred_element_type=jnp.float32) + params["b1"], 0.0)
    h = jnp.maximum(
        jnp.dot(h.astype(cd), params["w2"].astype(cd),
                preferred_element_type=jnp.float32) + params["b2"], 0.0)
    return (jnp.dot(h.astype(cd), params["w3"].astype(cd),
                    preferred_element_type=jnp.float32) + params["b3"])


if __name__ == "__main__":
    key = jax.random.PRNGKey(0)
    k_param, k_x1, k_x2 = jax.random.split(key, 3)

    state_size, action_size = 8, 4
    params = init_params(k_param, state_size, action_size)

    # --- small batch (single grid step), f32 --------------------------------
    x_small = jax.random.normal(k_x1, (8, state_size), jnp.float32)
    out = jax.block_until_ready(qnetwork_forward(x_small, params))
    ref = qnetwork_ref(x_small, params)
    assert out.shape == (8, action_size)
    assert jnp.allclose(out, ref, atol=1e-4, rtol=1e-4), "f32 small-batch mismatch"

    # --- larger batch (multi-step grid + row padding), f32 ------------------
    x_big = jax.random.normal(k_x2, (600, state_size), jnp.float32)
    out_big = jax.block_until_ready(qnetwork_forward(x_big, params))
    ref_big = qnetwork_ref(x_big, params)
    assert out_big.shape == (600, action_size)
    assert jnp.allclose(out_big, ref_big, atol=1e-4, rtol=1e-4), "f32 big-batch mismatch"

    # --- bf16 compute path (v6e/v7x MXU dtype), f32 accumulation ------------
    out_bf16 = jax.block_until_ready(
        qnetwork_forward(x_small, params, compute_dtype=jnp.bfloat16))
    ref_bf16 = qnetwork_ref(x_small, params, compute_dtype=jnp.bfloat16)
    assert jnp.allclose(out_bf16, ref_bf16, atol=1e-2, rtol=1e-2), "bf16 mismatch"

    print("KERNEL_OK")
</pallas_src>

<mosaic_0001>
module attributes {stable_mosaic.version = 11 : i64} {
  func.func @qnet_kernel(%arg0: i32, %arg1: memref<8x8xf32, #tpu.memory_space<vmem>>, %arg2: memref<8x64xf32, #tpu.memory_space<vmem>>, %arg3: memref<1x64xf32, #tpu.memory_space<vmem>>, %arg4: memref<64x64xf32, #tpu.memory_space<vmem>>, %arg5: memref<1x64xf32, #tpu.memory_space<vmem>>, %arg6: memref<64x128xf32, #tpu.memory_space<vmem>>, %arg7: memref<1x128xf32, #tpu.memory_space<vmem>>, %arg8: memref<8x128xf32, #tpu.memory_space<vmem>>) attributes {dimension_semantics = [#tpu.dimension_semantics<parallel>], iteration_bounds = array<i64: 1>, scalar_prefetch = 0 : i64, scratch_operands = 0 : i64, tpu.core_type = #tpu.core_type<tc>, window_params = [{transform_indices = @transform_0, window_bounds = array<i64: 8, 8>}, {pipeline_mode = #tpu.pipeline_mode<synchronous>, transform_indices = @transform_1, window_bounds = array<i64: 8, 64>}, {pipeline_mode = #tpu.pipeline_mode<synchronous>, transform_indices = @transform_2, window_bounds = array<i64: 1, 64>}, {pipeline_mode = #tpu.pipeline_mode<synchronous>, transform_indices = @transform_3, window_bounds = array<i64: 64, 64>}, {pipeline_mode = #tpu.pipeline_mode<synchronous>, transform_indices = @transform_4, window_bounds = array<i64: 1, 64>}, {pipeline_mode = #tpu.pipeline_mode<synchronous>, transform_indices = @transform_5, window_bounds = array<i64: 64, 128>}, {pipeline_mode = #tpu.pipeline_mode<synchronous>, transform_indices = @transform_6, window_bounds = array<i64: 1, 128>}, {transform_indices = @transform_7, window_bounds = array<i64: 8, 128>}]} {
    %c0 = arith.constant 0 : index
    %c0_0 = arith.constant 0 : index
    %0 = vector.load %arg1[%c0, %c0_0] : memref<8x8xf32, #tpu.memory_space<vmem>>, vector<8x8xf32>
    %c0_1 = arith.constant 0 : index
    %c0_2 = arith.constant 0 : index
    %1 = vector.load %arg2[%c0_1, %c0_2] : memref<8x64xf32, #tpu.memory_space<vmem>>, vector<8x64xf32>
    %cst = arith.constant dense<0.000000e+00> : vector<8x64xf32>
    %2 = tpu.matmul %0, %1, %cst {dimension_numbers = #tpu.dot_dimension_numbers<[1], [0], [0], [1], [0, 0, 1, 1], [], []>} : vector<8x8xf32>, vector<8x64xf32>, vector<8x64xf32> -> vector<8x64xf32>
    %c0_3 = arith.constant 0 : index
    %c0_4 = arith.constant 0 : index
    %3 = vector.load %arg3[%c0_3, %c0_4] : memref<1x64xf32, #tpu.memory_space<vmem>>, vector<1x64xf32>
    %4 = vector.broadcast %3 : vector<1x64xf32> to vector<8x64xf32>
    %5 = arith.addf %2, %4 : vector<8x64xf32>
    %cst_5 = arith.constant 0.000000e+00 : f32
    %6 = vector.broadcast %cst_5 : f32 to vector<8x64xf32>
    %7 = arith.maximumf %5, %6 : vector<8x64xf32>
    %c0_6 = arith.constant 0 : index
    %c0_7 = arith.constant 0 : index
    %8 = vector.load %arg4[%c0_6, %c0_7] : memref<64x64xf32, #tpu.memory_space<vmem>>, vector<64x64xf32>
    %cst_8 = arith.constant dense<0.000000e+00> : vector<8x64xf32>
    %9 = tpu.matmul %7, %8, %cst_8 {dimension_numbers = #tpu.dot_dimension_numbers<[1], [0], [0], [1], [0, 0, 1, 1], [], []>} : vector<8x64xf32>, vector<64x64xf32>, vector<8x64xf32> -> vector<8x64xf32>
    %c0_9 = arith.constant 0 : index
    %c0_10 = arith.constant 0 : index
    %10 = vector.load %arg5[%c0_9, %c0_10] : memref<1x64xf32, #tpu.memory_space<vmem>>, vector<1x64xf32>
    %11 = vector.broadcast %10 : vector<1x64xf32> to vector<8x64xf32>
    %12 = arith.addf %9, %11 : vector<8x64xf32>
    %cst_11 = arith.constant 0.000000e+00 : f32
    %13 = vector.broadcast %cst_11 : f32 to vector<8x64xf32>
    %14 = arith.maximumf %12, %13 : vector<8x64xf32>
    %c0_12 = arith.constant 0 : index
    %c0_13 = arith.constant 0 : index
    %15 = vector.load %arg6[%c0_12, %c0_13] : memref<64x128xf32, #tpu.memory_space<vmem>>, vector<64x128xf32>
    %cst_14 = arith.constant dense<0.000000e+00> : vector<8x128xf32>
    %16 = tpu.matmul %14, %15, %cst_14 {dimension_numbers = #tpu.dot_dimension_numbers<[1], [0], [0], [1], [0, 0, 1, 1], [], []>} : vector<8x64xf32>, vector<64x128xf32>, vector<8x128xf32> -> vector<8x128xf32>
    %c0_15 = arith.constant 0 : index
    %c0_16 = arith.constant 0 : index
    %17 = vector.load %arg7[%c0_15, %c0_16] : memref<1x128xf32, #tpu.memory_space<vmem>>, vector<1x128xf32>
    %18 = vector.broadcast %17 : vector<1x128xf32> to vector<8x128xf32>
    %19 = arith.addf %16, %18 : vector<8x128xf32>
    %c0_17 = arith.constant 0 : index
    %c0_18 = arith.constant 0 : index
    %20 = vector.load %arg8[%c0_17, %c0_18] : memref<8x128xf32, #tpu.memory_space<vmem>>, vector<8x128xf32>
    tpu.vector_store %arg8[%c0_17, %c0_18], %19 {strides = array<i32>} : memref<8x128xf32, #tpu.memory_space<vmem>>, vector<8x128xf32>,
    return
  }
  func.func @transform_0(%arg0: i32) -> (i32, i32) {
    %c0_i32 = arith.constant 0 : i32
    %c0_i32_0 = arith.constant 0 : i32
    return %arg0, %c0_i32 : i32, i32
  }
  func.func @transform_1(%arg0: i32) -> (i32, i32) {
    %c0_i32 = arith.constant 0 : i32
    %c0_i32_0 = arith.constant 0 : i32
    %c0_i32_1 = arith.constant 0 : i32
    return %c0_i32, %c0_i32_0 : i32, i32
  }
  func.func @transform_2(%arg0: i32) -> (i32, i32) {
    %c0_i32 = arith.constant 0 : i32
    %c0_i32_0 = arith.constant 0 : i32
    %c0_i32_1 = arith.constant 0 : i32
    return %c0_i32, %c0_i32_0 : i32, i32
  }
  func.func @transform_3(%arg0: i32) -> (i32, i32) {
    %c0_i32 = arith.constant 0 : i32
    %c0_i32_0 = arith.constant 0 : i32
    %c0_i32_1 = arith.constant 0 : i32
    return %c0_i32, %c0_i32_0 : i32, i32
  }
  func.func @transform_4(%arg0: i32) -> (i32, i32) {
    %c0_i32 = arith.constant 0 : i32
    %c0_i32_0 = arith.constant 0 : i32
    %c0_i32_1 = arith.constant 0 : i32
    return %c0_i32, %c0_i32_0 : i32, i32
  }
  func.func @transform_5(%arg0: i32) -> (i32, i32) {
    %c0_i32 = arith.constant 0 : i32
    %c0_i32_0 = arith.constant 0 : i32
    %c0_i32_1 = arith.constant 0 : i32
    return %c0_i32, %c0_i32_0 : i32, i32
  }
  func.func @transform_6(%arg0: i32) -> (i32, i32) {
    %c0_i32 = arith.constant 0 : i32
    %c0_i32_0 = arith.constant 0 : i32
    %c0_i32_1 = arith.constant 0 : i32
    return %c0_i32, %c0_i32_0 : i32, i32
  }
  func.func @transform_7(%arg0: i32) -> (i32, i32) {
    %c0_i32 = arith.constant 0 : i32
    %c0_i32_0 = arith.constant 0 : i32
    return %arg0, %c0_i32 : i32, i32
  }
}

</mosaic_0001>

<bundles_post_ra>
// kernel: tpu_custom_call.1
= control target key start
LH: loop header
LB: loop body
LE: loop exit
PB: predicated region body
PF: predicated region fallthrough
CT: control target
= control target key end

     0   :  { %12 = vsyncpa [#allocation3], 0  ;;  %s622_s0 = inlined_call_operand.hbm [shape: f32[8,8], index: 0, kind: input, shape index: {}]   ;;  %s623_s1 = inlined_call_operand.hbm [shape: f32[8,64], index: 1, kind: input, shape index: {}]   ;;  %s624_s2 = inlined_call_operand.vmem [shape: f32[1,64], index: 2, kind: input, shape index: {}]   ;;  %s625_s3 = inlined_call_operand.hbm [shape: f32[64,64], index: 3, kind: input, shape index: {}]   ;;  %s626_s4 = inlined_call_operand.vmem [shape: f32[1,64], index: 4, kind: input, shape index: {}]   ;;  %s627_s5 = inlined_call_operand.hbm [shape: f32[64,128], index: 5, kind: input, shape index: {}]   ;;  %s628_s6 = inlined_call_operand.vmem [shape: f32[1,128], index: 6, kind: input, shape index: {}]   ;;  %s629_s7 = inlined_call_operand.hbm [shape: f32[8,128], index: 7, kind: output, shape index: {}]  }
   0x1   :  { %13 = vsyncpa [#allocation6], 0 }
   0x2   :  { %14 = vsyncpa [#allocation9], 0 }
   0x3   :  { %15 = vsyncpa [#allocation4], 0  ;;  %s544_s24 = smov [#allocation5]   ;;  %s545_s26 = smov [#allocation2]  }
   0x4   :  { %s32_s25 = sshll.u32 %s544_s24, 4  ;;  %s22_s27 = sshll.u32 %s545_s26, 4  ;;  %s33_s25 = int_to_ptr.vmem [resolvable:$true] %s32_s25  ;;  %s23_s27 = int_to_ptr.vmem [resolvable:$true] %s22_s27 }
   0x5   :  { %s444_s28 = scalar_lea.vmem %s33_s25, 128  ;;  %p449_p1 = scmp.lt.s32.totalorder %s33_s25, %s33_s25 }
   0x6   :  { %p445_p0 = scmp.ne.s32.totalorder %s33_s25, %s444_s28  ;;  %p450_p2 = scmp.lt.s32.totalorder %s444_s28, %s444_s28 }
   0x8   :  { %p451_p3 = por %p450_p2, %p449_p1 }
   0xa   :  { %p452_p4 = pnand %p451_p3, %p445_p0 }
   0xc   :  { %455 = shalt.err (!%p452_p4)
}
   0xd   :  { %35 = dma.hbm_to_vmem [thread:$0]  %s623_s1, 128, %s33_s25, [#allocation6]  }
   0xe   :  { %s464_s8 = scalar_lea.vmem %s23_s27, 128  ;;  %p469_p6 = scmp.lt.s32.totalorder %s23_s27, %s23_s27 }
   0xf   :  { %p465_p5 = scmp.ne.s32.totalorder %s23_s27, %s464_s8  ;;  %p470_p7 = scmp.lt.s32.totalorder %s464_s8, %s464_s8 }
  0x11   :  { %p471_p8 = por %p470_p7, %p469_p6 }
  0x13   :  { %p472_p9 = pnand %p471_p8, %p465_p5 }
  0x15   :  { %475 = shalt.err (!%p472_p9)
}
  0x16   :  { %25 = dma.hbm_to_vmem [thread:$0]  %s622_s0, 128, %s23_s27, [#allocation3]  }
  0x17   :  { %s546_s11 = smov [#allocation7]  }
  0x18   :  { %s43_s12 = sshll.u32 %s546_s11, 4  ;;  %s44_s12 = int_to_ptr.vmem [resolvable:$true] %s43_s12 }
  0x19   :  { %s484_s13 = scalar_lea.vmem %s44_s12, 1024  ;;  %p489_p11 = scmp.lt.s32.totalorder %s44_s12, %s44_s12 }
  0x1a   :  { %p485_p10 = scmp.ne.s32.totalorder %s44_s12, %s484_s13  ;;  %p490_p12 = scmp.lt.s32.totalorder %s484_s13, %s484_s13 }
  0x1c   :  { %p491_p13 = por %p490_p12, %p489_p11 }
  0x1e   :  { %p492_p0 = pnand %p491_p13, %p485_p10 }
  0x20   :  { %495 = shalt.err (!%p492_p0)
}
  0x21   :  { %s547_s1 = smov 128   ;;  %s548_s14 = smov 8  }
  0x22   :  { %49 = dma.hbm_to_vmem [thread:$0]  %s625_s3, 1024, %s44_s12, [#allocation6], %s547_s1, %s547_s1, %s548_s14  }
  0x23   :  { %s549_s17 = smov [#allocation8]  }
  0x24   :  { %s57_s18 = sshll.u32 %s549_s17, 4  ;;  %s58_s18 = int_to_ptr.vmem [resolvable:$true] %s57_s18 }
  0x25   :  { %s504_s0 = scalar_lea.vmem %s58_s18, 1024  ;;  %p509_p2 = scmp.lt.s32.totalorder %s58_s18, %s58_s18 }
  0x26   :  { %p505_p1 = scmp.ne.s32.totalorder %s58_s18, %s504_s0  ;;  %p510_p3 = scmp.lt.s32.totalorder %s504_s0, %s504_s0 }
  0x28   :  { %p511_p4 = por %p510_p3, %p509_p2 }
  0x2a   :  { %p512_p5 = pnand %p511_p4, %p505_p1 }
  0x2c   :  { %515 = shalt.err (!%p512_p5)
}
  0x2d   :  { %63 = dma.hbm_to_vmem [thread:$0]  %s627_s5, 1024, %s58_s18, [#allocation9], %s547_s1, %s547_s1, %s548_s14  }
  0x2e   :  { %536 = dma.done.wait [#allocation3], 128  }
  0x2f   :  { %537 = vsyncadd [#allocation3], 4294967168 }
  0x30   :  { %538 = dma.done.wait [#allocation6], 1152  }
  0x31   :  { %539 = vsyncadd [#allocation6], 4294966144 }
  0x32   :  { %540 = dma.done.wait [#allocation9], 1024  }
  0x33   :  { %541 = vsyncadd [#allocation9], 4294966272  ;;  %v550_v0 = vmov 0.0   ;;  %vm551_vm0 = vmmov 0   ;;  %vm87_vm1 = vcmask 64512   ;;  %v79_v1 = vld [vmem:[#allocation5] sm:$0xff] }
  0x34   :  { %384 = vmatprep.subr.mxu0 %v550_v0  ;;  %386 = vmatprep.mubr.msk.f32.mxu0 %vm551_vm0, %v550_v0  ;;  %v78_v2 = vld [vmem:[#allocation2] sm:$0xff]  ;;  %v169_v3 = vld [vmem:[#allocation7 + $0x38] sm:$0xff]  ;;  %v167_v5 = vld [vmem:[#allocation7 + $0x28] sm:$0xff]  ;;  %vm177_vm2 = vcmask 523264   ;;  %s552_s24 = smov [#allocation10]  }
  0x35   :  { %389 = vmatprep.subr.mxu1 %v550_v0  ;;  %405 = vmatprep.mubr.msk.f32.mxu1 %vm551_vm0, %v550_v0  ;;  %v168_v4 = vld [vmem:[#allocation7 + $0x30] sm:$0xff]  ;;  %v166_v6 = vld [vmem:[#allocation7 + $0x20] sm:$0xff]  ;;  %v165_v7 = vld [vmem:[#allocation7 + $0x18] sm:$0xff]  ;;  %s347_s25 = sshll.u32 %s552_s24, 4  ;;  %s348_s25 = int_to_ptr.vmem [resolvable:$true] %s347_s25 }
  0x36   :  { %385 = vmatpush3.msra.mxu0 %v79_v1  ;;  %390 = vmatpush3.msra.mxu1 %v169_v3  ;;  %v164_v8 = vld [vmem:[#allocation7 + $0x10] sm:$0xff]  ;;  %v163_v9 = vld [vmem:[#allocation7 + $0x8] sm:$0xff]  ;;  %v162_v10 = vld [vmem:[#allocation7] sm:$0xff]  ;;  %s516_s26 = scalar_lea.vmem %s348_s25, 128  ;;  %p521_p7 = scmp.lt.s32.totalorder %s348_s25, %s348_s25 }
  0x37   :  { %387 = vmatmul.mubr.msk.f32.vlgmr.msra.gmra.mxu0 %vm87_vm1, %v78_v2  ;;  %391 = vmatprep.subr.mxu1 %v550_v0  ;;  %v259_v11 = vld [vmem:[#allocation8 + $0x38] sm:$0xff]  ;;  %v258_v12 = vld [vmem:[#allocation8 + $0x30] sm:$0xff]  ;;  %v257_v13 = vld [vmem:[#allocation8 + $0x28] sm:$0xff]  ;;  %p517_p6 = scmp.ne.s32.totalorder %s348_s25, %s516_s26  ;;  %p522_p8 = scmp.lt.s32.totalorder %s516_s26, %s516_s26 }
  0x38   :  { %392 = vmatpush3.msra.mxu1 %v168_v4  ;;  %408 = vmatprep.subr.mxu0 %v550_v0  ;;  %v256_v14 = vld [vmem:[#allocation8 + $0x20] sm:$0xff]  ;;  %v255_v15 = vld [vmem:[#allocation8 + $0x18] sm:$0xff]  ;;  %v358_v16 = vld [vmem:[%s624_s2] ss:$0 sm:$0xff] }
  0x39   :  { %393 = vmatprep.subr.mxu1 %v550_v0  ;;  %424 = vmatprep.mubr.msk.f32.mxu0 %vm551_vm0, %v550_v0  ;;  %v254_v21 = vld [vmem:[#allocation8 + $0x10] sm:$0xff]  ;;  %v253_v22 = vld [vmem:[#allocation8 + $0x8] sm:$0xff]  ;;  %v252_v23 = vld [vmem:[#allocation8] sm:$0xff]  ;;  %p523_p9 = por %p522_p8, %p521_p7 }
  0x3a   :  { %394 = vmatpush3.msra.mxu1 %v167_v5  ;;  %409 = vmatpush3.msra.mxu0 %v259_v11  ;;  %v360_v24 = vld [vmem:[%s626_s4] ss:$0 sm:$0xff] }
  0x3b   :  { %395 = vmatprep.subr.mxu1 %v550_v0  ;;  %410 = vmatprep.subr.mxu0 %v550_v0  ;;  %v362_v29 = vld [vmem:[%s628_s6] ss:$0 sm:$0xff]  ;;  %p524_p10 = pnand %p523_p9, %p517_p6 }
  0x3c   :  { %396 = vmatpush3.msra.mxu1 %v166_v6  ;;  %411 = vmatpush3.msra.mxu0 %v258_v12 }
  0x3d   :  { %397 = vmatprep.subr.mxu1 %v550_v0  ;;  %412 = vmatprep.subr.mxu0 %v550_v0 }
  0x3e   :  { %398 = vmatpush3.msra.mxu1 %v165_v7  ;;  %413 = vmatpush3.msra.mxu0 %v257_v13 }
  0x3f   :  { %399 = vmatprep.subr.mxu1 %v550_v0  ;;  %414 = vmatprep.subr.mxu0 %v550_v0 }
  0x40   :  { %400 = vmatpush3.msra.mxu1 %v164_v8  ;;  %415 = vmatpush3.msra.mxu0 %v256_v14 }
  0x41   :  { %401 = vmatprep.subr.mxu1 %v550_v0  ;;  %416 = vmatprep.subr.mxu0 %v550_v0 }
  0x42   :  { %402 = vmatpush3.msra.mxu1 %v163_v9  ;;  %417 = vmatpush3.msra.mxu0 %v255_v15 }
  0x43   :  { %403 = vmatprep.subr.mxu1 %v550_v0  ;;  %418 = vmatprep.subr.mxu0 %v550_v0 }
  0x44   :  { %404 = vmatpush3.msra.mxu1 %v162_v10  ;;  %419 = vmatpush3.msra.mxu0 %v254_v21 }
  0x45   :  { %420 = vmatprep.subr.mxu0 %v550_v0 }
  0x46   :  { %421 = vmatpush3.msra.mxu0 %v253_v22 }
  0x47   :  { %422 = vmatprep.subr.mxu0 %v550_v0 }
  0x48   :  { %423 = vmatpush3.msra.mxu0 %v252_v23 }
  0xf7   :  { %v157_v17 = vpop.f32.mrf.mxu0 }
  0xf8   :  { %v158_v18 = vadd.f32 %v358_v16, %v157_v17 }
  0xf9   :  { %v388_v19 = vpop.f32.mrf.mxu0 }
  0xfa   :  { %v161_v20 = vmax.f32 %v158_v18, 0.0 }
  0xfc   :  { %406 = vmatmul.mubr.msk.f32.vlgmr.msra.gmra.mxu1 %vm177_vm2, %v161_v20 }
 0x1bc   :  { %v247_v25 = vpop.f32.mrf.mxu1 }
 0x1bd   :  { %v248_v26 = vadd.f32 %v360_v24, %v247_v25 }
 0x1be   :  { %v407_v27 = vpop.f32.mrf.mxu1 }
 0x1bf   :  { %v251_v28 = vmax.f32 %v248_v26, 0.0 }
 0x1c1   :  { %425 = vmatmul.mubr.msk.f32.vlgmr.msra.gmra.mxu0 %vm177_vm2, %v251_v28 }
 0x281   :  { %v336_v30 = vpop.f32.mrf.mxu0 }
 0x282   :  { %v337_v31 = vadd.f32 %v362_v29, %v336_v30 }
 0x283   :  { %v426_v32 = vpop.f32.mrf.mxu0 }
 0x284   :  { %340 = vst [vmem:[#allocation10] sm:$0xff] %v337_v31 }
 0x285   :  { %527 = shalt.err (!%p524_p10)
}
 0x286   :  { %350 = dma.vmem_to_hbm [thread:$0]  %s348_s25, 128, %s629_s7, [#allocation4]  }
 0x287   :  { %542 = dma.done.wait [#allocation4], 128  }
 0x288   :  { %543 = vsyncadd [#allocation4], 4294967168 }
 0x289   :  { %354 = vsyncpa [#allocation3], 1 }
 0x28a   :  { %355 = vsyncpa [#allocation6], 1 }
 0x28b   :  { %356 = vsyncpa [#allocation9], 1 }
 0x28c   :  { %357 = vsyncpa [#allocation4], 1 }

</bundles_post_ra>
